<compile_context>
chip_gen: v5e
topology: v5e:2x2
jax: 0.10.0
libtpu: 0.0.40
codegen_flags: <defaults>
</compile_context>

<pallas_src>
import jax
import jax.numpy as jnp
from jax.experimental import pallas as pl
from jax.experimental.pallas import tpu as pltpu

LANE = 128      # TPU lane width
SUBLANE_BF16 = 16  # bf16 sublane packing


def _round_up(x, m):
    return ((x + m - 1) // m) * m


def coughnet_kernel(x_ref,
                    w1_ref, b1_ref,
                    w2_ref, b2_ref,
                    w3_ref, b3_ref,
                    w4_ref, b4_ref,
                    w5_ref, b5_ref,
                    w6_ref, b6_ref,
                    o_ref):
    """One batch tile: 6 matmuls (bf16 operands, f32 accum), ReLU on layers 1-5."""
    h = x_ref[...]  # bf16 (TM, F_pad)

    def dense(h_bf16, w_ref, b_ref, relu):
        # MXU matmul: bf16 x bf16 -> f32 accumulate; bias/ReLU in f32 (VPU).
        y = jnp.dot(h_bf16, w_ref[...],
                    preferred_element_type=jnp.float32) + b_ref[...]
        if relu:
            y = jnp.maximum(y, 0.0)
        return y

    h = dense(h, w1_ref, b1_ref, relu=True).astype(jnp.bfloat16)
    h = dense(h, w2_ref, b2_ref, relu=True).astype(jnp.bfloat16)
    h = dense(h, w3_ref, b3_ref, relu=True).astype(jnp.bfloat16)
    h = dense(h, w4_ref, b4_ref, relu=True).astype(jnp.bfloat16)
    h = dense(h, w5_ref, b5_ref, relu=True).astype(jnp.bfloat16)
    h = dense(h, w6_ref, b6_ref, relu=False)           # f32 (TM, 128 padded)

    o_ref[...] = h.astype(o_ref.dtype)


def prepare_padded_params(params, f_pad):
    """Pad every layer to lane-friendly shapes with zeros and cast weights to
    bf16 (biases stay f32).

      * layer-1 fan_in is padded to f_pad (input-feature lane padding),
      * every fan_out is padded up to the lane width (128).

    Padded weight rows/cols are zero, so the math is identical to the unpadded
    f32 network (up to bf16 rounding)."""
    padded = []
    prev_out_pad = f_pad
    for (w, b) in params:
        fan_in, fan_out = w.shape
        in_pad = prev_out_pad
        out_pad = max(fan_out, LANE)
        w_p = jnp.zeros((in_pad, out_pad), jnp.bfloat16)
        w_p = w_p.at[:fan_in, :fan_out].set(w.astype(jnp.bfloat16))
        b_p = jnp.zeros((1, out_pad), jnp.float32)
        b_p = b_p.at[:, :fan_out].set(b.astype(jnp.float32))
        padded.append((w_p, b_p))
        prev_out_pad = out_pad
    return padded


def coughnet_forward(x, params, *, tm=None):
    """x: [B, input_size] f32. params: list of (W[in,out] f32, b[1,out] f32)."""
    B, F = x.shape
    out_features = params[-1][0].shape[1]             # 2

    # Lane-dense input features.
    f_pad = _round_up(F, LANE)

    padded = prepare_padded_params(params, f_pad)
    out_pad = padded[-1][0].shape[1]                  # 128

    # Adaptive batch tile: don't burn a 128-row tile on a tiny batch, but cap
    # at 128 rows (full MXU tile) for large batches.
    if tm is None:
        tm = min(LANE, _round_up(B, SUBLANE_BF16))

    num_tiles = pl.cdiv(B, tm)
    b_pad = num_tiles * tm

    # Pad batch (rows) and features (lanes) with zeros; sliced off below.
    x_p = jnp.zeros((b_pad, f_pad), jnp.bfloat16)
    x_p = x_p.at[:B, :F].set(x.astype(jnp.bfloat16))

    flat = []
    weight_specs = []
    for w, b in padded:
        flat.extend([w, b])
        # Constant block index -> weights/biases stay resident across tiles.
        weight_specs.append(pl.BlockSpec(w.shape, lambda i: (0, 0)))
        weight_specs.append(pl.BlockSpec(b.shape, lambda i: (0, 0)))

    out = pl.pallas_call(
        coughnet_kernel,
        out_shape=jax.ShapeDtypeStruct((b_pad, out_pad), jnp.float32),
        grid=(num_tiles,),
        in_specs=[pl.BlockSpec((tm, f_pad), lambda i: (i, 0))] + weight_specs,
        out_specs=pl.BlockSpec((tm, out_pad), lambda i: (i, 0)),
        compiler_params=pltpu.CompilerParams(
            dimension_semantics=("parallel",)),
    )(x_p, *flat)

    return out[:B, :out_features]


def init_params(key, input_size):
    """Deterministic init matching the PyTorch layer shapes.

    PyTorch Linear stores weight as [out, in]; we store the transpose [in, out]
    so the kernel can do x @ W directly.
    """
    dims = [input_size, 512, 256, 128, 64, 10, 2]
    params = []
    for i in range(len(dims) - 1):
        fan_in, fan_out = dims[i], dims[i + 1]
        key, kw, kb = jax.random.split(key, 3)
        bound = 1.0 / jnp.sqrt(fan_in)
        w = jax.random.uniform(kw, (fan_in, fan_out), jnp.float32, -bound, bound)
        b = jax.random.uniform(kb, (1, fan_out), jnp.float32, -bound, bound)
        params.append((w, b))
    return params


def reference_forward(x, params):
    """Reference that mirrors the kernel's precision: bf16 operands, f32 accum."""
    h = x.astype(jnp.bfloat16)
    for i, (w, b) in enumerate(params):
        y = jnp.dot(h, w.astype(jnp.bfloat16),
                    preferred_element_type=jnp.float32) + b
        if i < len(params) - 1:
            h = jnp.maximum(y, 0.0).astype(jnp.bfloat16)
        else:
            h = y
    return h


if __name__ == "__main__":
    key = jax.random.PRNGKey(0)
    B, input_size = 8, 32

    key, kx, kp = jax.random.split(key, 3)
    x = jax.random.normal(kx, (B, input_size), jnp.float32)
    params = init_params(kp, input_size)

    out = coughnet_forward(x, params)
    out = jax.block_until_ready(out)

    ref = reference_forward(x, params)
    assert out.shape == (B, 2)
    assert jnp.allclose(out, ref, atol=1e-2, rtol=1e-2), (
        f"max abs diff {jnp.max(jnp.abs(out - ref))}")

    print("KERNEL_OK")
</pallas_src>

<mosaic_0001>
module attributes {stable_mosaic.version = 11 : i64} {
  func.func @coughnet_kernel(%arg0: i32, %arg1: memref<16x128xbf16, #tpu.memory_space<vmem>>, %arg2: memref<128x512xbf16, #tpu.memory_space<vmem>>, %arg3: memref<1x512xf32, #tpu.memory_space<vmem>>, %arg4: memref<512x256xbf16, #tpu.memory_space<vmem>>, %arg5: memref<1x256xf32, #tpu.memory_space<vmem>>, %arg6: memref<256x128xbf16, #tpu.memory_space<vmem>>, %arg7: memref<1x128xf32, #tpu.memory_space<vmem>>, %arg8: memref<128x128xbf16, #tpu.memory_space<vmem>>, %arg9: memref<1x128xf32, #tpu.memory_space<vmem>>, %arg10: memref<128x128xbf16, #tpu.memory_space<vmem>>, %arg11: memref<1x128xf32, #tpu.memory_space<vmem>>, %arg12: memref<128x128xbf16, #tpu.memory_space<vmem>>, %arg13: memref<1x128xf32, #tpu.memory_space<vmem>>, %arg14: memref<16x128xf32, #tpu.memory_space<vmem>>) attributes {dimension_semantics = [#tpu.dimension_semantics<parallel>], iteration_bounds = array<i64: 1>, scalar_prefetch = 0 : i64, scratch_operands = 0 : i64, tpu.core_type = #tpu.core_type<tc>, window_params = [{transform_indices = @transform_0, window_bounds = array<i64: 16, 128>}, {pipeline_mode = #tpu.pipeline_mode<synchronous>, transform_indices = @transform_1, window_bounds = array<i64: 128, 512>}, {pipeline_mode = #tpu.pipeline_mode<synchronous>, transform_indices = @transform_2, window_bounds = array<i64: 1, 512>}, {pipeline_mode = #tpu.pipeline_mode<synchronous>, transform_indices = @transform_3, window_bounds = array<i64: 512, 256>}, {pipeline_mode = #tpu.pipeline_mode<synchronous>, transform_indices = @transform_4, window_bounds = array<i64: 1, 256>}, {pipeline_mode = #tpu.pipeline_mode<synchronous>, transform_indices = @transform_5, window_bounds = array<i64: 256, 128>}, {pipeline_mode = #tpu.pipeline_mode<synchronous>, transform_indices = @transform_6, window_bounds = array<i64: 1, 128>}, {pipeline_mode = #tpu.pipeline_mode<synchronous>, transform_indices = @transform_7, window_bounds = array<i64: 128, 128>}, {pipeline_mode = #tpu.pipeline_mode<synchronous>, transform_indices = @transform_8, window_bounds = array<i64: 1, 128>}, {pipeline_mode = #tpu.pipeline_mode<synchronous>, transform_indices = @transform_9, window_bounds = array<i64: 128, 128>}, {pipeline_mode = #tpu.pipeline_mode<synchronous>, transform_indices = @transform_10, window_bounds = array<i64: 1, 128>}, {pipeline_mode = #tpu.pipeline_mode<synchronous>, transform_indices = @transform_11, window_bounds = array<i64: 128, 128>}, {pipeline_mode = #tpu.pipeline_mode<synchronous>, transform_indices = @transform_12, window_bounds = array<i64: 1, 128>}, {transform_indices = @transform_13, window_bounds = array<i64: 16, 128>}]} {
    %c0 = arith.constant 0 : index
    %c0_0 = arith.constant 0 : index
    %0 = vector.load %arg1[%c0, %c0_0] : memref<16x128xbf16, #tpu.memory_space<vmem>>, vector<16x128xbf16>
    %c0_1 = arith.constant 0 : index
    %c0_2 = arith.constant 0 : index
    %1 = vector.load %arg2[%c0_1, %c0_2] : memref<128x512xbf16, #tpu.memory_space<vmem>>, vector<128x512xbf16>
    %cst = arith.constant dense<0.000000e+00> : vector<16x512xf32>
    %2 = tpu.matmul %0, %1, %cst {dimension_numbers = #tpu.dot_dimension_numbers<[1], [0], [0], [1], [0, 0, 1, 1], [], []>} : vector<16x128xbf16>, vector<128x512xbf16>, vector<16x512xf32> -> vector<16x512xf32>
    %c0_3 = arith.constant 0 : index
    %c0_4 = arith.constant 0 : index
    %3 = vector.load %arg3[%c0_3, %c0_4] : memref<1x512xf32, #tpu.memory_space<vmem>>, vector<1x512xf32>
    %4 = vector.broadcast %3 : vector<1x512xf32> to vector<16x512xf32>
    %5 = arith.addf %2, %4 : vector<16x512xf32>
    %cst_5 = arith.constant 0.000000e+00 : f32
    %6 = vector.broadcast %cst_5 : f32 to vector<16x512xf32>
    %7 = arith.maximumf %5, %6 : vector<16x512xf32>
    %8 = arith.truncf %7 : vector<16x512xf32> to vector<16x512xbf16>
    %c0_6 = arith.constant 0 : index
    %c0_7 = arith.constant 0 : index
    %9 = vector.load %arg4[%c0_6, %c0_7] : memref<512x256xbf16, #tpu.memory_space<vmem>>, vector<512x256xbf16>
    %cst_8 = arith.constant dense<0.000000e+00> : vector<16x256xf32>
    %10 = tpu.matmul %8, %9, %cst_8 {dimension_numbers = #tpu.dot_dimension_numbers<[1], [0], [0], [1], [0, 0, 1, 1], [], []>} : vector<16x512xbf16>, vector<512x256xbf16>, vector<16x256xf32> -> vector<16x256xf32>
    %c0_9 = arith.constant 0 : index
    %c0_10 = arith.constant 0 : index
    %11 = vector.load %arg5[%c0_9, %c0_10] : memref<1x256xf32, #tpu.memory_space<vmem>>, vector<1x256xf32>
    %12 = vector.broadcast %11 : vector<1x256xf32> to vector<16x256xf32>
    %13 = arith.addf %10, %12 : vector<16x256xf32>
    %cst_11 = arith.constant 0.000000e+00 : f32
    %14 = vector.broadcast %cst_11 : f32 to vector<16x256xf32>
    %15 = arith.maximumf %13, %14 : vector<16x256xf32>
    %16 = arith.truncf %15 : vector<16x256xf32> to vector<16x256xbf16>
    %c0_12 = arith.constant 0 : index
    %c0_13 = arith.constant 0 : index
    %17 = vector.load %arg6[%c0_12, %c0_13] : memref<256x128xbf16, #tpu.memory_space<vmem>>, vector<256x128xbf16>
    %cst_14 = arith.constant dense<0.000000e+00> : vector<16x128xf32>
    %18 = tpu.matmul %16, %17, %cst_14 {dimension_numbers = #tpu.dot_dimension_numbers<[1], [0], [0], [1], [0, 0, 1, 1], [], []>} : vector<16x256xbf16>, vector<256x128xbf16>, vector<16x128xf32> -> vector<16x128xf32>
    %c0_15 = arith.constant 0 : index
    %c0_16 = arith.constant 0 : index
    %19 = vector.load %arg7[%c0_15, %c0_16] : memref<1x128xf32, #tpu.memory_space<vmem>>, vector<1x128xf32>
    %20 = vector.broadcast %19 : vector<1x128xf32> to vector<16x128xf32>
    %21 = arith.addf %18, %20 : vector<16x128xf32>
    %cst_17 = arith.constant 0.000000e+00 : f32
    %22 = vector.broadcast %cst_17 : f32 to vector<16x128xf32>
    %23 = arith.maximumf %21, %22 : vector<16x128xf32>
    %24 = arith.truncf %23 : vector<16x128xf32> to vector<16x128xbf16>
    %c0_18 = arith.constant 0 : index
    %c0_19 = arith.constant 0 : index
    %25 = vector.load %arg8[%c0_18, %c0_19] : memref<128x128xbf16, #tpu.memory_space<vmem>>, vector<128x128xbf16>
    %cst_20 = arith.constant dense<0.000000e+00> : vector<16x128xf32>
    %26 = tpu.matmul %24, %25, %cst_20 {dimension_numbers = #tpu.dot_dimension_numbers<[1], [0], [0], [1], [0, 0, 1, 1], [], []>} : vector<16x128xbf16>, vector<128x128xbf16>, vector<16x128xf32> -> vector<16x128xf32>
    %c0_21 = arith.constant 0 : index
    %c0_22 = arith.constant 0 : index
    %27 = vector.load %arg9[%c0_21, %c0_22] : memref<1x128xf32, #tpu.memory_space<vmem>>, vector<1x128xf32>
    %28 = vector.broadcast %27 : vector<1x128xf32> to vector<16x128xf32>
    %29 = arith.addf %26, %28 : vector<16x128xf32>
    %cst_23 = arith.constant 0.000000e+00 : f32
    %30 = vector.broadcast %cst_23 : f32 to vector<16x128xf32>
    %31 = arith.maximumf %29, %30 : vector<16x128xf32>
    %32 = arith.truncf %31 : vector<16x128xf32> to vector<16x128xbf16>
    %c0_24 = arith.constant 0 : index
    %c0_25 = arith.constant 0 : index
    %33 = vector.load %arg10[%c0_24, %c0_25] : memref<128x128xbf16, #tpu.memory_space<vmem>>, vector<128x128xbf16>
    %cst_26 = arith.constant dense<0.000000e+00> : vector<16x128xf32>
    %34 = tpu.matmul %32, %33, %cst_26 {dimension_numbers = #tpu.dot_dimension_numbers<[1], [0], [0], [1], [0, 0, 1, 1], [], []>} : vector<16x128xbf16>, vector<128x128xbf16>, vector<16x128xf32> -> vector<16x128xf32>
    %c0_27 = arith.constant 0 : index
    %c0_28 = arith.constant 0 : index
    %35 = vector.load %arg11[%c0_27, %c0_28] : memref<1x128xf32, #tpu.memory_space<vmem>>, vector<1x128xf32>
    %36 = vector.broadcast %35 : vector<1x128xf32> to vector<16x128xf32>
    %37 = arith.addf %34, %36 : vector<16x128xf32>
    %cst_29 = arith.constant 0.000000e+00 : f32
    %38 = vector.broadcast %cst_29 : f32 to vector<16x128xf32>
    %39 = arith.maximumf %37, %38 : vector<16x128xf32>
    %40 = arith.truncf %39 : vector<16x128xf32> to vector<16x128xbf16>
    %c0_30 = arith.constant 0 : index
    %c0_31 = arith.constant 0 : index
    %41 = vector.load %arg12[%c0_30, %c0_31] : memref<128x128xbf16, #tpu.memory_space<vmem>>, vector<128x128xbf16>
    %cst_32 = arith.constant dense<0.000000e+00> : vector<16x128xf32>
    %42 = tpu.matmul %40, %41, %cst_32 {dimension_numbers = #tpu.dot_dimension_numbers<[1], [0], [0], [1], [0, 0, 1, 1], [], []>} : vector<16x128xbf16>, vector<128x128xbf16>, vector<16x128xf32> -> vector<16x128xf32>
    %c0_33 = arith.constant 0 : index
    %c0_34 = arith.constant 0 : index
    %43 = vector.load %arg13[%c0_33, %c0_34] : memref<1x128xf32, #tpu.memory_space<vmem>>, vector<1x128xf32>
    %44 = vector.broadcast %43 : vector<1x128xf32> to vector<16x128xf32>
    %45 = arith.addf %42, %44 : vector<16x128xf32>
    %c0_35 = arith.constant 0 : index
    %c0_36 = arith.constant 0 : index
    %46 = vector.load %arg14[%c0_35, %c0_36] : memref<16x128xf32, #tpu.memory_space<vmem>>, vector<16x128xf32>
    tpu.vector_store %arg14[%c0_35, %c0_36], %45 {strides = array<i32>} : memref<16x128xf32, #tpu.memory_space<vmem>>, vector<16x128xf32>,
    return
  }
  func.func @transform_0(%arg0: i32) -> (i32, i32) {
    %c0_i32 = arith.constant 0 : i32
    %c0_i32_0 = arith.constant 0 : i32
    return %arg0, %c0_i32 : i32, i32
  }
  func.func @transform_1(%arg0: i32) -> (i32, i32) {
    %c0_i32 = arith.constant 0 : i32
    %c0_i32_0 = arith.constant 0 : i32
    %c0_i32_1 = arith.constant 0 : i32
    return %c0_i32, %c0_i32_0 : i32, i32
  }
  func.func @transform_2(%arg0: i32) -> (i32, i32) {
    %c0_i32 = arith.constant 0 : i32
    %c0_i32_0 = arith.constant 0 : i32
    %c0_i32_1 = arith.constant 0 : i32
    return %c0_i32, %c0_i32_0 : i32, i32
  }
  func.func @transform_3(%arg0: i32) -> (i32, i32) {
    %c0_i32 = arith.constant 0 : i32
    %c0_i32_0 = arith.constant 0 : i32
    %c0_i32_1 = arith.constant 0 : i32
    return %c0_i32, %c0_i32_0 : i32, i32
  }
  func.func @transform_4(%arg0: i32) -> (i32, i32) {
    %c0_i32 = arith.constant 0 : i32
    %c0_i32_0 = arith.constant 0 : i32
    %c0_i32_1 = arith.constant 0 : i32
    return %c0_i32, %c0_i32_0 : i32, i32
  }
  func.func @transform_5(%arg0: i32) -> (i32, i32) {
    %c0_i32 = arith.constant 0 : i32
    %c0_i32_0 = arith.constant 0 : i32
    %c0_i32_1 = arith.constant 0 : i32
    return %c0_i32, %c0_i32_0 : i32, i32
  }
  func.func @transform_6(%arg0: i32) -> (i32, i32) {
    %c0_i32 = arith.constant 0 : i32
    %c0_i32_0 = arith.constant 0 : i32
    %c0_i32_1 = arith.constant 0 : i32
    return %c0_i32, %c0_i32_0 : i32, i32
  }
  func.func @transform_7(%arg0: i32) -> (i32, i32) {
    %c0_i32 = arith.constant 0 : i32
    %c0_i32_0 = arith.constant 0 : i32
    %c0_i32_1 = arith.constant 0 : i32
    return %c0_i32, %c0_i32_0 : i32, i32
  }
  func.func @transform_8(%arg0: i32) -> (i32, i32) {
    %c0_i32 = arith.constant 0 : i32
    %c0_i32_0 = arith.constant 0 : i32
    %c0_i32_1 = arith.constant 0 : i32
    return %c0_i32, %c0_i32_0 : i32, i32
  }
  func.func @transform_9(%arg0: i32) -> (i32, i32) {
    %c0_i32 = arith.constant 0 : i32
    %c0_i32_0 = arith.constant 0 : i32
    %c0_i32_1 = arith.constant 0 : i32
    return %c0_i32, %c0_i32_0 : i32, i32
  }
  func.func @transform_10(%arg0: i32) -> (i32, i32) {
    %c0_i32 = arith.constant 0 : i32
    %c0_i32_0 = arith.constant 0 : i32
    %c0_i32_1 = arith.constant 0 : i32
    return %c0_i32, %c0_i32_0 : i32, i32
  }
  func.func @transform_11(%arg0: i32) -> (i32, i32) {
    %c0_i32 = arith.constant 0 : i32
    %c0_i32_0 = arith.constant 0 : i32
    %c0_i32_1 = arith.constant 0 : i32
    return %c0_i32, %c0_i32_0 : i32, i32
  }
  func.func @transform_12(%arg0: i32) -> (i32, i32) {
    %c0_i32 = arith.constant 0 : i32
    %c0_i32_0 = arith.constant 0 : i32
    %c0_i32_1 = arith.constant 0 : i32
    return %c0_i32, %c0_i32_0 : i32, i32
  }
  func.func @transform_13(%arg0: i32) -> (i32, i32) {
    %c0_i32 = arith.constant 0 : i32
    %c0_i32_0 = arith.constant 0 : i32
    return %arg0, %c0_i32 : i32, i32
  }
}

</mosaic_0001>

<bundles_post_ra>
// kernel: tpu_custom_call.1
= control target key start
LH: loop header
LB: loop body
LE: loop exit
PB: predicated region body
PF: predicated region fallthrough
CT: control target
= control target key end

     0   :  { %18 = vsyncpa [#allocation3], 0  ;;  %s2474_s0 = inlined_call_operand.hbm [shape: bf16[16,128], index: 0, kind: input, shape index: {}]   ;;  %s2475_s1 = inlined_call_operand.hbm [shape: bf16[128,512], index: 1, kind: input, shape index: {}]   ;;  %s2476_s2 = inlined_call_operand.hbm [shape: f32[1,512], index: 2, kind: input, shape index: {}]   ;;  %s2477_s3 = inlined_call_operand.hbm [shape: bf16[512,256], index: 3, kind: input, shape index: {}]   ;;  %s2478_s4 = inlined_call_operand.vmem [shape: f32[1,256], index: 4, kind: input, shape index: {}]   ;;  %s2479_s5 = inlined_call_operand.hbm [shape: bf16[256,128], index: 5, kind: input, shape index: {}]   ;;  %s2480_s6 = inlined_call_operand.vmem [shape: f32[1,128], index: 6, kind: input, shape index: {}]   ;;  %s2481_s7 = inlined_call_operand.hbm [shape: bf16[128,128], index: 7, kind: input, shape index: {}]   ;;  %s2482_s8 = inlined_call_operand.vmem [shape: f32[1,128], index: 8, kind: input, shape index: {}]   ;;  %s2483_s9 = inlined_call_operand.hbm [shape: bf16[128,128], index: 9, kind: input, shape index: {}]   ;;  %s2484_s10 = inlined_call_operand.vmem [shape: f32[1,128], index: 10, kind: input, shape index: {}]   ;;  %s2485_s11 = inlined_call_operand.hbm [shape: bf16[128,128], index: 11, kind: input, shape index: {}]   ;;  %s2486_s12 = inlined_call_operand.vmem [shape: f32[1,128], index: 12, kind: input, shape index: {}]   ;;  %s2487_s13 = inlined_call_operand.hbm [shape: f32[16,128], index: 13, kind: output, shape index: {}]  }
   0x1   :  { %19 = vsyncpa [#allocation6], 0 }
   0x2   :  { %20 = vsyncpa [#allocation9], 0 }
   0x3   :  { %21 = vsyncpa [#allocation12], 0 }
   0x4   :  { %22 = vsyncpa [#allocation15], 0  ;;  %s41_s27 = sshll.u32 %s2475_s1, 4  ;;  %s42_s27 = int_to_ptr.hbm [resolvable:$true] %s41_s27 }
   0x5   :  { %23 = vsyncpa [#allocation4], 0  ;;  %s2326_s28 = smov [#allocation5]   ;;  %s65_s15 = sshll.u32 %s2477_s3, 4  ;;  %s66_s15 = int_to_ptr.hbm [resolvable:$true] %s65_s15 }
   0x6   :  { %s43_s29 = sshll.u32 %s2326_s28, 4  ;;  %s2327_s16 = smov 256   ;;  %s44_s29 = int_to_ptr.vmem [resolvable:$true] %s43_s29 }
   0x7   :  { %s2328_s17 = smov 16   ;;  %s2329_s18 = smov [#allocation8]  }
   0x8   :  { %49 = dma.hbm_to_vmem [thread:$0]  %s42_s27, 4096, %s44_s29, [#allocation6], %s2327_s16, %s2327_s16, %s2328_s17  }
   0x9   :  { %s67_s19 = sshll.u32 %s2329_s18, 4  ;;  %s2330_s20 = smov 128   ;;  %s68_s19 = int_to_ptr.vmem [resolvable:$true] %s67_s19 }
   0xa   :  { %s2331_s21 = smov 8   ;;  %s95_s23 = sshll.u32 %s2481_s7, 4  ;;  %s96_s23 = int_to_ptr.hbm [resolvable:$true] %s95_s23 }
   0xb   :  { %73 = dma.hbm_to_vmem [thread:$0]  %s66_s15, 8192, %s68_s19, [#allocation9], %s2330_s20, %s2330_s20, %s2331_s21  }
   0xc   :  { %s2332_s24 = smov [#allocation11]   ;;  %s28_s27 = sshll.u32 %s2474_s0, 4  ;;  %s29_s27 = int_to_ptr.hbm [resolvable:$true] %s28_s27 }
   0xd   :  { %s97_s3 = sshll.u32 %s2332_s24, 4  ;;  %s2333_s28 = smov 64   ;;  %s98_s3 = int_to_ptr.vmem [resolvable:$true] %s97_s3 }
   0xe   :  { %s2334_s29 = smov 4   ;;  %s2335_s30 = smov [#allocation2]  }
   0xf   :  { %103 = dma.hbm_to_vmem [thread:$0]  %s96_s23, 1024, %s98_s3, [#allocation12], %s2333_s28, %s2333_s28, %s2334_s29  }
  0x10   :  { %s30_s14 = sshll.u32 %s2335_s30, 4  ;;  %s55_s7 = sshll.u32 %s2476_s2, 4  ;;  %s31_s14 = int_to_ptr.vmem [resolvable:$true] %s30_s14  ;;  %s56_s7 = int_to_ptr.hbm [resolvable:$true] %s55_s7 }
  0x11   :  { %36 = dma.hbm_to_vmem [thread:$0]  %s29_s27, 128, %s31_s14, [#allocation3], %s2333_s28, %s2333_s28, %s2334_s29  }
  0x12   :  { %s80_s18 = sshll.u32 %s2479_s5, 4  ;;  %s2336_s19 = smov [#allocation7]   ;;  %s81_s18 = int_to_ptr.hbm [resolvable:$true] %s80_s18 }
  0x13   :  { %s57_s1 = sshll.u32 %s2336_s19, 4  ;;  %s2337_s22 = smov [#allocation10]   ;;  %s58_s1 = int_to_ptr.vmem [resolvable:$true] %s57_s1 }
  0x14   :  { %60 = dma.hbm_to_vmem [thread:$0]  %s56_s7, 64, %s58_s1, [#allocation6]  }
  0x15   :  { %s82_s23 = sshll.u32 %s2337_s22, 4  ;;  %s110_s2 = sshll.u32 %s2483_s9, 4  ;;  %s83_s23 = int_to_ptr.vmem [resolvable:$true] %s82_s23  ;;  %s111_s2 = int_to_ptr.hbm [resolvable:$true] %s110_s2 }
  0x16   :  { %88 = dma.hbm_to_vmem [thread:$0]  %s81_s18, 2048, %s83_s23, [#allocation9], %s2333_s28, %s2333_s28, %s2334_s29  }
  0x17   :  { %s125_s5 = sshll.u32 %s2485_s11, 4  ;;  %s2338_s27 = smov [#allocation13]   ;;  %s126_s5 = int_to_ptr.hbm [resolvable:$true] %s125_s5 }
  0x18   :  { %s112_s30 = sshll.u32 %s2338_s27, 4  ;;  %s2339_s14 = smov [#allocation14]   ;;  %s113_s30 = int_to_ptr.vmem [resolvable:$true] %s112_s30 }
  0x19   :  { %118 = dma.hbm_to_vmem [thread:$0]  %s111_s2, 1024, %s113_s30, [#allocation12], %s2333_s28, %s2333_s28, %s2334_s29  }
  0x1a   :  { %s127_s9 = sshll.u32 %s2339_s14, 4  ;;  %s128_s9 = int_to_ptr.vmem [resolvable:$true] %s127_s9 }
  0x1b   :  { %133 = dma.hbm_to_vmem [thread:$0]  %s126_s5, 1024, %s128_s9, [#allocation15], %s2333_s28, %s2333_s28, %s2334_s29  }
  0x1c   :  { %2314 = dma.done.wait [#allocation3], 128  }
  0x1d   :  { %2315 = vsyncadd [#allocation3], 4294967168 }
  0x1e   :  { %2316 = dma.done.wait [#allocation6], 4160  }
  0x1f   :  { %2317 = vsyncadd [#allocation6], 4294963136 }
  0x20   :  { %2318 = dma.done.wait [#allocation9], 10240  }
  0x21   :  { %2319 = vsyncadd [#allocation9], 4294957056 }
  0x22   :  { %2320 = dma.done.wait [#allocation12], 2048  }
  0x23   :  { %2321 = vsyncadd [#allocation12], 4294965248 }
  0x24   :  { %2322 = dma.done.wait [#allocation15], 1024  }
  0x25   :  { %2323 = vsyncadd [#allocation15], 4294966272  ;;  %v1512_v0 = vld [vmem:[#allocation5 + $0xe0] sm:$0xf]  ;;  %v1973_v1 = vld [vmem:[#allocation5 + $0xec] sm:$0xf0] }
  0x26   :  { %v1971_v2 = vld [vmem:[#allocation5 + $0xe4] sm:$0xf]  ;;  %v1513_v3 = vor.u32 %v1973_v1, %v1512_v0  ;;  %v1514_v4 = vld [vmem:[#allocation5 + $0xf0] sm:$0xf0]  ;;  %v1520_v5 = vld [vmem:[#allocation5 + $0xe8] sm:$0xf] }
  0x27   :  { %v1974_v6 = vld [vmem:[#allocation5 + $0xf4] sm:$0xf0]  ;;  %v1517_v7 = vor.u32 %v1971_v2, %v1514_v4  ;;  %v1972_v9 = vld [vmem:[#allocation5 + $0xec] sm:$0xf]  ;;  %v1522_v10 = vld [vmem:[#allocation5 + $0xf8] sm:$0xf0] }
  0x28   :  { %v1521_v8 = vor.u32 %v1974_v6, %v1520_v5  ;;  %v1496_v11 = vld [vmem:[#allocation5 + $0xc0] sm:$0xf]  ;;  %378 = vmatpush.bf16.msra.mxu0 %v1513_v3  ;;  %v1525_v12 = vor.u32 %v1972_v9, %v1522_v10  ;;  %v1969_v13 = vld [vmem:[#allocation5 + $0xcc] sm:$0xf0]  ;;  %v1967_v14 = vld [vmem:[#allocation5 + $0xc4] sm:$0xf] }
  0x29   :  { %v1498_v15 = vld [vmem:[#allocation5 + $0xd0] sm:$0xf0]  ;;  %392 = vmatpush.bf16.msra.mxu1 %v1517_v7  ;;  %v1497_v16 = vor.u32 %v1969_v13, %v1496_v11  ;;  %v1504_v18 = vld [vmem:[#allocation5 + $0xc8] sm:$0xf]  ;;  %v1970_v19 = vld [vmem:[#allocation5 + $0xd4] sm:$0xf0] }
  0x2a   :  { %406 = vmatpush.bf16.msra.mxu2 %v1521_v8  ;;  %v1501_v17 = vor.u32 %v1967_v14, %v1498_v15  ;;  %v1968_v20 = vld [vmem:[#allocation5 + $0xcc] sm:$0xf]  ;;  %420 = vmatpush.bf16.msra.mxu3 %v1525_v12  ;;  %v1505_v21 = vor.u32 %v1970_v19, %v1504_v18  ;;  %v1506_v22 = vld [vmem:[#allocation5 + $0xd8] sm:$0xf0]  ;;  %v1480_v23 = vld [vmem:[#allocation5 + $0xa0] sm:$0xf] }
  0x2b   :  { %v1965_v24 = vld [vmem:[#allocation5 + $0xac] sm:$0xf0]  ;;  %v1509_v25 = vor.u32 %v1968_v20, %v1506_v22  ;;  %v1963_v26 = vld [vmem:[#allocation5 + $0xa4] sm:$0xf]  ;;  %v1482_v27 = vld [vmem:[#allocation5 + $0xb0] sm:$0xf0] }
  0x2c   :  { %v1488_v28 = vld [vmem:[#allocation5 + $0xa8] sm:$0xf]  ;;  %379 = vmatpush.bf16.msra.mxu0 %v1497_v16  ;;  %v1481_v29 = vor.u32 %v1965_v24, %v1480_v23  ;;  %v1966_v30 = vld [vmem:[#allocation5 + $0xb4] sm:$0xf0]  ;;  %v1964_v31 = vld [vmem:[#allocation5 + $0xac] sm:$0xf]  ;;  %v1485_v33 = vor.u32 %v1963_v26, %v1482_v27 }
  0x2d   :  { %v1490_v32 = vld [vmem:[#allocation5 + $0xb8] sm:$0xf0]  ;;  %393 = vmatpush.bf16.msra.mxu1 %v1501_v17  ;;  %v1489_v34 = vor.u32 %v1966_v30, %v1488_v28  ;;  %v1464_v35 = vld [vmem:[#allocation5 + $0x80] sm:$0xf]  ;;  %v1961_v36 = vld [vmem:[#allocation5 + $0x8c] sm:$0xf0] }
  0x2e   :  { %407 = vmatpush.bf16.msra.mxu2 %v1505_v21  ;;  %v1959_v37 = vld [vmem:[#allocation5 + $0x84] sm:$0xf]  ;;  %421 = vmatpush.bf16.msra.mxu3 %v1509_v25  ;;  %v1493_v38 = vor.u32 %v1964_v31, %v1490_v32  ;;  %v1466_v39 = vld [vmem:[#allocation5 + $0x90] sm:$0xf0]  ;;  %v1472_v40 = vld [vmem:[#allocation5 + $0x88] sm:$0xf]  ;;  %v1465_v44 = vor.u32 %v1961_v36, %v1464_v35 }
  0x2f   :  { %v1962_v41 = vld [vmem:[#allocation5 + $0x94] sm:$0xf0]  ;;  %v1960_v42 = vld [vmem:[#allocation5 + $0x8c] sm:$0xf]  ;;  %v1474_v43 = vld [vmem:[#allocation5 + $0x98] sm:$0xf0]  ;;  %v1469_v45 = vor.u32 %v1959_v37, %v1466_v39 }
  0x30   :  { %380 = vmatpush.bf16.msra.mxu0 %v1481_v29  ;;  %v1473_v46 = vor.u32 %v1962_v41, %v1472_v40  ;;  %v1448_v47 = vld [vmem:[#allocation5 + $0x60] sm:$0xf]  ;;  %v1957_v48 = vld [vmem:[#allocation5 + $0x6c] sm:$0xf0]  ;;  %v1955_v49 = vld [vmem:[#allocation5 + $0x64] sm:$0xf]  ;;  %v1477_v50 = vor.u32 %v1960_v42, %v1474_v43 }
  0x31   :  { %394 = vmatpush.bf16.msra.mxu1 %v1485_v33  ;;  %v1450_v51 = vld [vmem:[#allocation5 + $0x70] sm:$0xf0]  ;;  %v1456_v52 = vld [vmem:[#allocation5 + $0x68] sm:$0xf]  ;;  %v1958_v53 = vld [vmem:[#allocation5 + $0x74] sm:$0xf0]  ;;  %v1449_v56 = vor.u32 %v1957_v48, %v1448_v47 }
  0x32   :  { %408 = vmatpush.bf16.msra.mxu2 %v1489_v34  ;;  %422 = vmatpush.bf16.msra.mxu3 %v1493_v38  ;;  %v1956_v54 = vld [vmem:[#allocation5 + $0x6c] sm:$0xf]  ;;  %v1458_v55 = vld [vmem:[#allocation5 + $0x78] sm:$0xf0]  ;;  %v1453_v57 = vor.u32 %v1955_v49, %v1450_v51  ;;  %v1457_v58 = vor.u32 %v1958_v53, %v1456_v52  ;;  %v1432_v59 = vld [vmem:[#allocation5 + $0x40] sm:$0xf] }
  0x33   :  { %v1953_v60 = vld [vmem:[#allocation5 + $0x4c] sm:$0xf0]  ;;  %v1951_v61 = vld [vmem:[#allocation5 + $0x44] sm:$0xf]  ;;  %v1461_v62 = vor.u32 %v1956_v54, %v1458_v55  ;;  %v1434_v63 = vld [vmem:[#allocation5 + $0x50] sm:$0xf0] }
  0x34   :  { %381 = vmatpush.bf16.msra.mxu0 %v1465_v44  ;;  %v1440_v0 = vld [vmem:[#allocation5 + $0x48] sm:$0xf]  ;;  %v1954_v1 = vld [vmem:[#allocation5 + $0x54] sm:$0xf0]  ;;  %v1952_v2 = vld [vmem:[#allocation5 + $0x4c] sm:$0xf]  ;;  %v1433_v4 = vor.u32 %v1953_v60, %v1432_v59  ;;  %v1437_v5 = vor.u32 %v1951_v61, %v1434_v63 }
  0x35   :  { %395 = vmatpush.bf16.msra.mxu1 %v1469_v45  ;;  %v1442_v3 = vld [vmem:[#allocation5 + $0x58] sm:$0xf0]  ;;  %v1441_v6 = vor.u32 %v1954_v1, %v1440_v0  ;;  %v1416_v7 = vld [vmem:[#allocation5 + $0x20] sm:$0xf]  ;;  %v1949_v8 = vld [vmem:[#allocation5 + $0x2c] sm:$0xf0] }
  0x36   :  { %409 = vmatpush.bf16.msra.mxu2 %v1473_v46  ;;  %423 = vmatpush.bf16.msra.mxu3 %v1477_v50  ;;  %v1947_v9 = vld [vmem:[#allocation5 + $0x24] sm:$0xf]  ;;  %v1445_v10 = vor.u32 %v1952_v2, %v1442_v3  ;;  %v1418_v11 = vld [vmem:[#allocation5 + $0x30] sm:$0xf0]  ;;  %v1424_v12 = vld [vmem:[#allocation5 + $0x28] sm:$0xf]  ;;  %v1417_v16 = vor.u32 %v1949_v8, %v1416_v7 }
  0x37   :  { %v1950_v13 = vld [vmem:[#allocation5 + $0x34] sm:$0xf0]  ;;  %v1948_v14 = vld [vmem:[#allocation5 + $0x2c] sm:$0xf]  ;;  %v1426_v15 = vld [vmem:[#allocation5 + $0x38] sm:$0xf0]  ;;  %v1421_v18 = vor.u32 %v1947_v9, %v1418_v11 }
  0x38   :  { %382 = vmatpush.bf16.msra.mxu0 %v1449_v56  ;;  %v1400_v17 = vld [vmem:[#allocation5] sm:$0xf]  ;;  %v1425_v19 = vor.u32 %v1950_v13, %v1424_v12  ;;  %v1945_v20 = vld [vmem:[#allocation5 + $0xc] sm:$0xf0]  ;;  %v1943_v21 = vld [vmem:[#allocation5 + $0x4] sm:$0xf]  ;;  %v1429_v23 = vor.u32 %v1948_v14, %v1426_v15 }
  0x39   :  { %396 = vmatpush.bf16.msra.mxu1 %v1453_v57  ;;  %v1402_v22 = vld [vmem:[#allocation5 + $0x10] sm:$0xf0]  ;;  %v1408_v24 = vld [vmem:[#allocation5 + $0x8] sm:$0xf]  ;;  %v1946_v25 = vld [vmem:[#allocation5 + $0x14] sm:$0xf0]  ;;  %v1401_v30 = vor.u32 %v1945_v20, %v1400_v17 }
  0x3a   :  { %410 = vmatpush.bf16.msra.mxu2 %v1457_v58  ;;  %424 = vmatpush.bf16.msra.mxu3 %v1461_v62  ;;  %v1944_v26 = vld [vmem:[#allocation5 + $0xc] sm:$0xf]  ;;  %v1410_v27 = vld [vmem:[#allocation5 + $0x18] sm:$0xf0]  ;;  %v1584_v28 = vld [vmem:[#allocation8 + $0x70] sm:$0xf]  ;;  %v1405_v33 = vor.u32 %v1943_v21, %v1402_v22  ;;  %v1409_v34 = vor.u32 %v1946_v25, %v1408_v24 }
  0x3b   :  { %v1990_v29 = vld [vmem:[#allocation8 + $0x74] sm:$0xf0]  ;;  %v1648_v31 = vld [vmem:[#allocation8 + $0xf0] sm:$0xf]  ;;  %v1413_v36 = vor.u32 %v1944_v26, %v1410_v27  ;;  %v1576_v38 = vld [vmem:[#allocation8 + $0x60] sm:$0xf] }
  0x3c   :  { %383 = vmatpush.bf16.msra.mxu0 %v1433_v4  ;;  %v2006_v32 = vld [vmem:[#allocation8 + $0xf4] sm:$0xf0]  ;;  %v1585_v37 = vor.u32 %v1990_v29, %v1584_v28  ;;  %v1712_v39 = vld [vmem:[#allocation8 + $0x170] sm:$0xf]  ;;  %v1988_v42 = vld [vmem:[#allocation8 + $0x64] sm:$0xf0] }
  0x3d   :  { %397 = vmatpush.bf16.msra.mxu1 %v1437_v5  ;;  %v1942_v35 = vld [vmem:[#allocation2] sm:$0xff]  ;;  %v1649_v41 = vor.u32 %v2006_v32, %v1648_v31  ;;  %v1776_v43 = vld [vmem:[#allocation8 + $0x1f0] sm:$0xf]  ;;  %v1640_v45 = vld [vmem:[#allocation8 + $0xe0] sm:$0xf]  ;;  %v1577_v48 = vor.u32 %v1988_v42, %v1576_v38  ;;  %s2340_s17 = smov [#allocation16]  }
  0x3e   :  { %411 = vmatpush.bf16.msra.mxu2 %v1441_v6  ;;  %425 = vmatpush.bf16.msra.mxu3 %v1445_v10  ;;  %v2022_v40 = vld [vmem:[#allocation8 + $0x174] sm:$0xf0]  ;;  %v2004_v46 = vld [vmem:[#allocation8 + $0xe4] sm:$0xf0]  ;;  %v1568_v50 = vld [vmem:[#allocation8 + $0x50] sm:$0xf] }
  0x3f   :  { %v2038_v44 = vld [vmem:[#allocation8 + $0x1f4] sm:$0xf0]  ;;  %v1713_v47 = vor.u32 %v2022_v40, %v1712_v39  ;;  %v1704_v51 = vld [vmem:[#allocation8 + $0x160] sm:$0xf]  ;;  %v2020_v52 = vld [vmem:[#allocation8 + $0x164] sm:$0xf0]  ;;  %v1641_v53 = vor.u32 %v2004_v46, %v1640_v45 }
  0x40   :  { %384 = vmatpush.bf16.msra.mxu0 %v1417_v16  ;;  %v1777_v49 = vor.u32 %v2038_v44, %v1776_v43  ;;  %v1986_v54 = vld [vmem:[#allocation8 + $0x54] sm:$0xf0]  ;;  %v1768_v55 = vld [vmem:[#allocation8 + $0x1e0] sm:$0xf]  ;;  %v2036_v56 = vld [vmem:[#allocation8 + $0x1e4] sm:$0xf0]  ;;  %v1705_v59 = vor.u32 %v2020_v52, %v1704_v51 }
  0x41   :  { %398 = vmatpush.bf16.msra.mxu1 %v1421_v18  ;;  %v1632_v57 = vld [vmem:[#allocation8 + $0xd0] sm:$0xf]  ;;  %v2002_v58 = vld [vmem:[#allocation8 + $0xd4] sm:$0xf0]  ;;  %v1569_v60 = vor.u32 %v1986_v54, %v1568_v50  ;;  %v1769_v61 = vor.u32 %v2036_v56, %v1768_v55  ;;  %v1560_v62 = vld [vmem:[#allocation8 + $0x40] sm:$0xf] }
  0x42   :  { %412 = vmatpush.bf16.msra.mxu2 %v1425_v19  ;;  %426 = vmatpush.bf16.msra.mxu3 %v1429_v23  ;;  %v1696_v63 = vld [vmem:[#allocation8 + $0x150] sm:$0xf]  ;;  %v2018_v0 = vld [vmem:[#allocation8 + $0x154] sm:$0xf0]  ;;  %v1633_v1 = vor.u32 %v2002_v58, %v1632_v57  ;;  %v1984_v2 = vld [vmem:[#allocation8 + $0x44] sm:$0xf0] }
  0x43   :  { %v1760_v3 = vld [vmem:[#allocation8 + $0x1d0] sm:$0xf]  ;;  %v2034_v4 = vld [vmem:[#allocation8 + $0x1d4] sm:$0xf0]  ;;  %v1624_v5 = vld [vmem:[#allocation8 + $0xc0] sm:$0xf]  ;;  %v1697_v7 = vor.u32 %v2018_v0, %v1696_v63  ;;  %v1561_v11 = vor.u32 %v1984_v2, %v1560_v62 }
  0x44   :  { %385 = vmatpush.bf16.msra.mxu0 %v1401_v30  ;;  %v2000_v6 = vld [vmem:[#allocation8 + $0xc4] sm:$0xf0]  ;;  %v1552_v8 = vld [vmem:[#allocation8 + $0x30] sm:$0xf]  ;;  %v1982_v9 = vld [vmem:[#allocation8 + $0x34] sm:$0xf0]  ;;  %v1761_v12 = vor.u32 %v2034_v4, %v1760_v3 }
  0x45   :  { %399 = vmatpush.bf16.msra.mxu1 %v1405_v33  ;;  %v1688_v10 = vld [vmem:[#allocation8 + $0x140] sm:$0xf]  ;;  %v2016_v13 = vld [vmem:[#allocation8 + $0x144] sm:$0xf0]  ;;  %v1625_v14 = vor.u32 %v2000_v6, %v1624_v5  ;;  %v1616_v17 = vld [vmem:[#allocation8 + $0xb0] sm:$0xf]  ;;  %v1553_v20 = vor.u32 %v1982_v9, %v1552_v8 }
  0x46   :  { %413 = vmatpush.bf16.msra.mxu2 %v1409_v34  ;;  %427 = vmatpush.bf16.msra.mxu3 %v1413_v36  ;;  %v1752_v15 = vld [vmem:[#allocation8 + $0x1c0] sm:$0xf]  ;;  %v2032_v16 = vld [vmem:[#allocation8 + $0x1c4] sm:$0xf0]  ;;  %v1998_v18 = vld [vmem:[#allocation8 + $0xb4] sm:$0xf0]  ;;  %v1689_v19 = vor.u32 %v2016_v13, %v1688_v10 }
  0x47   :  { %386 = vmatmul.bf16.vlgmr.msra.gmra.mxu0 %v1942_v35  ;;  %v1753_v21 = vor.u32 %v2032_v16, %v1752_v15  ;;  %v1544_v22 = vld [vmem:[#allocation8 + $0x20] sm:$0xf]  ;;  %v1680_v23 = vld [vmem:[#allocation8 + $0x130] sm:$0xf]  ;;  %v2014_v24 = vld [vmem:[#allocation8 + $0x134] sm:$0xf0]  ;;  %v1617_v25 = vor.u32 %v1998_v18, %v1616_v17 }
  0x48   :  { %836 = vmatpush.bf16.msrb.mxu0 %v1585_v37  ;;  %400 = vmatmul.bf16.vlgmr.msra.gmra.mxu1 %v1942_v35  ;;  %v1980_v26 = vld [vmem:[#allocation8 + $0x24] sm:$0xf0]  ;;  %v1744_v27 = vld [vmem:[#allocation8 + $0x1b0] sm:$0xf]  ;;  %v2030_v28 = vld [vmem:[#allocation8 + $0x1b4] sm:$0xf0]  ;;  %v1681_v31 = vor.u32 %v2014_v24, %v1680_v23 }
  0x49   :  { %850 = vmatpush.bf16.msrb.mxu1 %v1649_v41  ;;  %414 = vmatmul.bf16.vlgmr.msra.gmra.mxu2 %v1942_v35  ;;  %v1608_v29 = vld [vmem:[#allocation8 + $0xa0] sm:$0xf]  ;;  %v1996_v30 = vld [vmem:[#allocation8 + $0xa4] sm:$0xf0]  ;;  %v1545_v32 = vor.u32 %v1980_v26, %v1544_v22  ;;  %v1745_v33 = vor.u32 %v2030_v28, %v1744_v27  ;;  %v1536_v34 = vld [vmem:[#allocation8 + $0x10] sm:$0xf] }
  0x4a   :  { %428 = vmatmul.bf16.vlgmr.msra.gmra.mxu3 %v1942_v35  ;;  %864 = vmatpush.bf16.msrb.mxu2 %v1713_v47  ;;  %v1672_v35 = vld [vmem:[#allocation8 + $0x120] sm:$0xf]  ;;  %v2012_v36 = vld [vmem:[#allocation8 + $0x124] sm:$0xf0]  ;;  %v1609_v37 = vor.u32 %v1996_v30, %v1608_v29  ;;  %v1978_v38 = vld [vmem:[#allocation8 + $0x14] sm:$0xf0] }
  0x4b   :  { %878 = vmatpush.bf16.msrb.mxu3 %v1777_v49  ;;  %v1736_v39 = vld [vmem:[#allocation8 + $0x1a0] sm:$0xf]  ;;  %v2028_v40 = vld [vmem:[#allocation8 + $0x1a4] sm:$0xf0]  ;;  %v1600_v41 = vld [vmem:[#allocation8 + $0x90] sm:$0xf]  ;;  %v1673_v43 = vor.u32 %v2012_v36, %v1672_v35  ;;  %v1537_v44 = vor.u32 %v1978_v38, %v1536_v34 }
  0x4c   :  { %837 = vmatpush.bf16.msrb.mxu0 %v1577_v48  ;;  %v1994_v42 = vld [vmem:[#allocation8 + $0x94] sm:$0xf0]  ;;  %v1737_v45 = vor.u32 %v2028_v40, %v1736_v39  ;;  %v1528_v47 = vld [vmem:[#allocation8] sm:$0xf]  ;;  %v1976_v48 = vld [vmem:[#allocation8 + $0x4] sm:$0xf0] }
  0x4d   :  { %851 = vmatpush.bf16.msrb.mxu1 %v1641_v53  ;;  %v1601_v46 = vor.u32 %v1994_v42, %v1600_v41  ;;  %v1592_v49 = vld [vmem:[#allocation8 + $0x80] sm:$0xf]  ;;  %v1992_v50 = vld [vmem:[#allocation8 + $0x84] sm:$0xf0]  ;;  %v1529_v51 = vor.u32 %v1976_v48, %v1528_v47  ;;  %v1989_v53 = vld [vmem:[#allocation8 + $0x74] sm:$0xf] }
  0x4e   :  { %865 = vmatpush.bf16.msrb.mxu2 %v1705_v59  ;;  %v1593_v52 = vor.u32 %v1992_v50, %v1592_v49  ;;  %v1586_v54 = vld [vmem:[#allocation8 + $0x78] sm:$0xf0]  ;;  %v2005_v55 = vld [vmem:[#allocation8 + $0xf4] sm:$0xf]  ;;  %v1664_v58 = vld [vmem:[#allocation8 + $0x110] sm:$0xf] }
  0x4f   :  { %879 = vmatpush.bf16.msrb.mxu3 %v1769_v61  ;;  %v1589_v56 = vor.u32 %v1989_v53, %v1586_v54  ;;  %v1650_v57 = vld [vmem:[#allocation8 + $0xf8] sm:$0xf0]  ;;  %v2010_v59 = vld [vmem:[#allocation8 + $0x114] sm:$0xf0]  ;;  %v1728_v62 = vld [vmem:[#allocation8 + $0x190] sm:$0xf] }
  0x50   :  { %838 = vmatpush.bf16.msrb.mxu0 %v1569_v60  ;;  %v1653_v60 = vor.u32 %v2005_v55, %v1650_v57  ;;  %v1665_v61 = vor.u32 %v2010_v59, %v1664_v58  ;;  %v2026_v63 = vld [vmem:[#allocation8 + $0x194] sm:$0xf0]  ;;  %v1578_v2 = vld [vmem:[#allocation8 + $0x68] sm:$0xf0]  ;;  %v2003_v4 = vld [vmem:[#allocation8 + $0xe4] sm:$0xf] }
  0x51   :  { %852 = vmatpush.bf16.msrb.mxu1 %v1633_v1  ;;  %v1729_v0 = vor.u32 %v2026_v63, %v1728_v62  ;;  %v1987_v1 = vld [vmem:[#allocation8 + $0x64] sm:$0xf]  ;;  %v1642_v5 = vld [vmem:[#allocation8 + $0xe8] sm:$0xf0]  ;;  %v1656_v6 = vld [vmem:[#allocation8 + $0x100] sm:$0xf] }
  0x52   :  { %866 = vmatpush.bf16.msrb.mxu2 %v1697_v7  ;;  %v1581_v3 = vor.u32 %v1987_v1, %v1578_v2  ;;  %v1645_v7 = vor.u32 %v2003_v4, %v1642_v5  ;;  %v2008_v8 = vld [vmem:[#allocation8 + $0x104] sm:$0xf0]  ;;  %v1720_v9 = vld [vmem:[#allocation8 + $0x180] sm:$0xf]  ;;  %v2021_v13 = vld [vmem:[#allocation8 + $0x174] sm:$0xf] }
  0x53   :  { %880 = vmatpush.bf16.msrb.mxu3 %v1761_v12  ;;  %v2024_v10 = vld [vmem:[#allocation8 + $0x184] sm:$0xf0]  ;;  %v2037_v16 = vld [vmem:[#allocation8 + $0x1f4] sm:$0xf]  ;;  %v1778_v17 = vld [vmem:[#allocation8 + $0x1f8] sm:$0xf0] }
  0x54   :  { %839 = vmatpush.bf16.msrb.mxu0 %v1561_v11  ;;  %v1657_v11 = vor.u32 %v2008_v8, %v1656_v6  ;;  %v1721_v12 = vor.u32 %v2024_v10, %v1720_v9  ;;  %v1985_v18 = vld [vmem:[#allocation8 + $0x54] sm:$0xf]  ;;  %v1634_v22 = vld [vmem:[#allocation8 + $0xd8] sm:$0xf0]  ;;  %v1706_v26 = vld [vmem:[#allocation8 + $0x168] sm:$0xf0] }
  0x55   :  { %853 = vmatpush.bf16.msrb.mxu1 %v1625_v14  ;;  %v1714_v14 = vld [vmem:[#allocation8 + $0x178] sm:$0xf0]  ;;  %v2035_v28 = vld [vmem:[#allocation8 + $0x1e4] sm:$0xf]  ;;  %v1770_v29 = vld [vmem:[#allocation8 + $0x1e8] sm:$0xf0] }
  0x56   :  { %867 = vmatpush.bf16.msrb.mxu2 %v1689_v19  ;;  %v1717_v15 = vor.u32 %v2021_v13, %v1714_v14  ;;  %v1781_v19 = vor.u32 %v2037_v16, %v1778_v17  ;;  %v1773_v30 = vor.u32 %v2035_v28, %v1770_v29  ;;  %v1626_v35 = vld [vmem:[#allocation8 + $0xc8] sm:$0xf0]  ;;  %v1698_v38 = vld [vmem:[#allocation8 + $0x158] sm:$0xf0]  ;;  %v2033_v39 = vld [vmem:[#allocation8 + $0x1d4] sm:$0xf] }
  0x57   :  { %881 = vmatpush.bf16.msrb.mxu3 %v1753_v21  ;;  %v2001_v21 = vld [vmem:[#allocation8 + $0xd4] sm:$0xf]  ;;  %v1762_v41 = vld [vmem:[#allocation8 + $0x1d8] sm:$0xf0]  ;;  %v2015_v49 = vld [vmem:[#allocation8 + $0x144] sm:$0xf] }
  0x58   :  { %840 = vmatpush.bf16.msrb.mxu0 %v1553_v20  ;;  %v1570_v20 = vld [vmem:[#allocation8 + $0x58] sm:$0xf0]  ;;  %v1637_v24 = vor.u32 %v2001_v21, %v1634_v22  ;;  %v1765_v42 = vor.u32 %v2033_v39, %v1762_v41  ;;  %v1690_v50 = vld [vmem:[#allocation8 + $0x148] sm:$0xf0]  ;;  %v1979_v55 = vld [vmem:[#allocation8 + $0x24] sm:$0xf] }
  0x59   :  { %854 = vmatpush.bf16.msrb.mxu1 %v1617_v25  ;;  %v1573_v23 = vor.u32 %v1985_v18, %v1570_v20  ;;  %v2019_v25 = vld [vmem:[#allocation8 + $0x164] sm:$0xf]  ;;  %v1618_v47 = vld [vmem:[#allocation8 + $0xb8] sm:$0xf0]  ;;  %v1754_v53 = vld [vmem:[#allocation8 + $0x1c8] sm:$0xf0] }
  0x5a   :  { %868 = vmatpush.bf16.msrb.mxu2 %v1681_v31  ;;  %v1709_v27 = vor.u32 %v2019_v25, %v1706_v26  ;;  %v1983_v31 = vld [vmem:[#allocation8 + $0x44] sm:$0xf]  ;;  %v1610_v59 = vld [vmem:[#allocation8 + $0xa8] sm:$0xf0]  ;;  %v1682_v62 = vld [vmem:[#allocation8 + $0x138] sm:$0xf0] }
  0x5b   :  { %882 = vmatpush.bf16.msrb.mxu3 %v1745_v33  ;;  %v1999_v33 = vld [vmem:[#allocation8 + $0xc4] sm:$0xf]  ;;  %v2029_v63 = vld [vmem:[#allocation8 + $0x1b4] sm:$0xf]  ;;  %v1746_v1 = vld [vmem:[#allocation8 + $0x1b8] sm:$0xf0] }
  0x5c   :  { %841 = vmatpush.bf16.msrb.mxu0 %v1545_v32  ;;  %v1562_v32 = vld [vmem:[#allocation8 + $0x48] sm:$0xf0]  ;;  %v1629_v36 = vor.u32 %v1999_v33, %v1626_v35  ;;  %v1995_v57 = vld [vmem:[#allocation8 + $0xa4] sm:$0xf]  ;;  %v1749_v2 = vor.u32 %v2029_v63, %v1746_v1  ;;  %v1538_v4 = vld [vmem:[#allocation8 + $0x18] sm:$0xf0] }
  0x5d   :  { %855 = vmatpush.bf16.msrb.mxu1 %v1609_v37  ;;  %v1565_v34 = vor.u32 %v1983_v31, %v1562_v32  ;;  %v2017_v37 = vld [vmem:[#allocation8 + $0x154] sm:$0xf]  ;;  %v2011_v8 = vld [vmem:[#allocation8 + $0x124] sm:$0xf]  ;;  %v1674_v9 = vld [vmem:[#allocation8 + $0x128] sm:$0xf0] }
  0x5e   :  { %869 = vmatpush.bf16.msrb.mxu2 %v1673_v43  ;;  %v1701_v40 = vor.u32 %v2017_v37, %v1698_v38  ;;  %v1981_v43 = vld [vmem:[#allocation8 + $0x34] sm:$0xf]  ;;  %v1738_v13 = vld [vmem:[#allocation8 + $0x1a8] sm:$0xf0]  ;;  %v1975_v14 = vld [vmem:[#allocation8 + $0x4] sm:$0xf] }
  0x5f   :  { %883 = vmatpush.bf16.msrb.mxu3 %v1737_v45  ;;  %v1997_v45 = vld [vmem:[#allocation8 + $0xb4] sm:$0xf]  ;;  %v1530_v16 = vld [vmem:[#allocation8 + $0x8] sm:$0xf0]  ;;  %v1991_v17 = vld [vmem:[#allocation8 + $0x84] sm:$0xf] }
  0x60   :  { %842 = vmatpush.bf16.msrb.mxu0 %v1537_v44  ;;  %v1554_v44 = vld [vmem:[#allocation8 + $0x38] sm:$0xf0]  ;;  %v1621_v48 = vor.u32 %v1997_v45, %v1618_v47  ;;  %v1993_v5 = vld [vmem:[#allocation8 + $0x94] sm:$0xf]  ;;  %v1594_v18 = vld [vmem:[#allocation8 + $0x88] sm:$0xf0] }
  0x61   :  { %856 = vmatpush.bf16.msrb.mxu1 %v1601_v46  ;;  %v1557_v46 = vor.u32 %v1981_v43, %v1554_v44  ;;  %v1597_v20 = vor.u32 %v1991_v17, %v1594_v18  ;;  %v2009_v21 = vld [vmem:[#allocation8 + $0x114] sm:$0xf]  ;;  %v1666_v22 = vld [vmem:[#allocation8 + $0x118] sm:$0xf0]  ;;  %v2007_v29 = vld [vmem:[#allocation8 + $0x104] sm:$0xf] }
  0x62   :  { %870 = vmatpush.bf16.msrb.mxu2 %v1665_v61  ;;  %v2013_v61 = vld [vmem:[#allocation8 + $0x134] sm:$0xf]  ;;  %v1669_v25 = vor.u32 %v2009_v21, %v1666_v22  ;;  %v2023_v31 = vld [vmem:[#allocation8 + $0x184] sm:$0xf]  ;;  %v1722_v35 = vld [vmem:[#allocation8 + $0x188] sm:$0xf0] }
  0x63   :  { %884 = vmatpush.bf16.msrb.mxu3 %v1729_v0  ;;  %v1685_v0 = vor.u32 %v2013_v61, %v1682_v62  ;;  %v1725_v37 = vor.u32 %v2023_v31, %v1722_v35  ;;  %v510_v17 = vld [vmem:[%s2478_s4] sm:$0x3]  ;;  %v2047_v22 = vld [vmem:[#allocation10 + $0x40] sm:$0xff]  ;;  %s1375_s18 = sshll.u32 %s2340_s17, 4  ;;  %s1376_s18 = int_to_ptr.vmem [resolvable:$true] %s1375_s18 }
  0x64   :  { %843 = vmatpush.bf16.msrb.mxu0 %v1529_v51  ;;  %v2031_v51 = vld [vmem:[#allocation8 + $0x1c4] sm:$0xf] }
  0x65   :  { %857 = vmatpush.bf16.msrb.mxu1 %v1593_v52  ;;  %v1693_v52 = vor.u32 %v2015_v49, %v1690_v50  ;;  %v1757_v54 = vor.u32 %v2031_v51, %v1754_v53 }
  0x66   :  { %871 = vmatpush.bf16.msrb.mxu2 %v1657_v11  ;;  %v1677_v11 = vor.u32 %v2011_v8, %v1674_v9  ;;  %v2041_v8 = vld [vmem:[#allocation10 + $0x10] sm:$0xff] }
  0x67   :  { %885 = vmatpush.bf16.msrb.mxu3 %v1721_v12  ;;  %v2027_v12 = vld [vmem:[#allocation8 + $0x1a4] sm:$0xf]  ;;  %v2053_v9 = vld [vmem:[#allocation10 + $0x70] sm:$0xff] }
  0x68   :  { %892 = vmatpush.bf16.msra.mxu0 %v1589_v56  ;;  %v1546_v56 = vld [vmem:[#allocation8 + $0x28] sm:$0xf0] }
  0x69   :  { %906 = vmatpush.bf16.msra.mxu1 %v1653_v60  ;;  %v1549_v58 = vor.u32 %v1979_v55, %v1546_v56  ;;  %v1613_v60 = vor.u32 %v1995_v57, %v1610_v59 }
  0x6a   :  { %920 = vmatpush.bf16.msra.mxu2 %v1717_v15  ;;  %v1741_v15 = vor.u32 %v2027_v12, %v1738_v13  ;;  %v2039_v12 = vld [vmem:[#allocation10] sm:$0xff] }
  0x6b   :  { %934 = vmatpush.bf16.msra.mxu3 %v1781_v19  ;;  %v1533_v19 = vor.u32 %v1975_v14, %v1530_v16  ;;  %v2051_v13 = vld [vmem:[#allocation10 + $0x60] sm:$0xff]  ;;  %v2050_v14 = vld [vmem:[#allocation10 + $0x58] sm:$0xff]  ;;  %v2049_v16 = vld [vmem:[#allocation10 + $0x50] sm:$0xff] }
  0x6c   :  { %893 = vmatpush.bf16.msra.mxu0 %v1581_v3  ;;  %v1977_v3 = vld [vmem:[#allocation8 + $0x14] sm:$0xf] }
  0x6d   :  { %907 = vmatpush.bf16.msra.mxu1 %v1645_v7  ;;  %v1541_v6 = vor.u32 %v1977_v3, %v1538_v4  ;;  %v1602_v7 = vld [vmem:[#allocation8 + $0x98] sm:$0xf0]  ;;  %v2045_v3 = vld [vmem:[#allocation10 + $0x30] sm:$0xff]  ;;  %v2044_v4 = vld [vmem:[#allocation10 + $0x28] sm:$0xff] }
  0x6e   :  { %921 = vmatpush.bf16.msra.mxu2 %v1709_v27  ;;  %v1605_v10 = vor.u32 %v1993_v5, %v1602_v7  ;;  %v202_v27 = vld [vmem:[#allocation7] sm:$0xf]  ;;  %v2043_v5 = vld [vmem:[#allocation10 + $0x20] sm:$0xff] }
  0x6f   :  { %935 = vmatpush.bf16.msra.mxu3 %v1773_v30  ;;  %v1658_v30 = vld [vmem:[#allocation8 + $0x108] sm:$0xf0]  ;;  %v204_v32 = vperm.slane %v202_v27, 0  ;;  %v206_v47 = vperm.slane %v202_v27, 2  ;;  %v207_v49 = vperm.slane %v202_v27, 3  ;;  %v2054_v7 = vld [vmem:[#allocation10 + $0x78] sm:$0xff] }
  0x70   :  { %894 = vmatpush.bf16.msra.mxu0 %v1573_v23  ;;  %v2025_v23 = vld [vmem:[#allocation8 + $0x194] sm:$0xf] }
  0x71   :  { %908 = vmatpush.bf16.msra.mxu1 %v1637_v24  ;;  %v1730_v24 = vld [vmem:[#allocation8 + $0x198] sm:$0xf0] }
  0x72   :  { %922 = vmatpush.bf16.msra.mxu2 %v1701_v40  ;;  %v1733_v26 = vor.u32 %v2025_v23, %v1730_v24 }
  0x73   :  { %936 = vmatpush.bf16.msra.mxu3 %v1765_v42 }
  0x74   :  { %895 = vmatpush.bf16.msra.mxu0 %v1565_v34  ;;  %v1661_v34 = vor.u32 %v2007_v29, %v1658_v30 }
  0x75   :  { %909 = vmatpush.bf16.msra.mxu1 %v1629_v36  ;;  %v205_v36 = vperm.slane %v202_v27, 1 }
  0x76   :  { %923 = vmatpush.bf16.msra.mxu2 %v1693_v52  ;;  %v2046_v52 = vld [vmem:[#allocation10 + $0x38] sm:$0xff] }
  0x77   :  { %937 = vmatpush.bf16.msra.mxu3 %v1757_v54 }
  0x78   :  { %896 = vmatpush.bf16.msra.mxu0 %v1557_v46 }
  0x79   :  { %910 = vmatpush.bf16.msra.mxu1 %v1621_v48 }
  0x7a   :  { %924 = vmatpush.bf16.msra.mxu2 %v1685_v0 }
  0x7b   :  { %938 = vmatpush.bf16.msra.mxu3 %v1749_v2 }
  0x7c   :  { %897 = vmatpush.bf16.msra.mxu0 %v1549_v58 }
  0x7d   :  { %911 = vmatpush.bf16.msra.mxu1 %v1613_v60 }
  0x7e   :  { %925 = vmatpush.bf16.msra.mxu2 %v1677_v11  ;;  %v2052_v11 = vld [vmem:[#allocation10 + $0x68] sm:$0xff] }
  0x7f   :  { %939 = vmatpush.bf16.msra.mxu3 %v1741_v15 }
  0x80   :  { %898 = vmatpush.bf16.msra.mxu0 %v1541_v6  ;;  %v2042_v6 = vld [vmem:[#allocation10 + $0x18] sm:$0xff] }
  0x81   :  { %912 = vmatpush.bf16.msra.mxu1 %v1605_v10  ;;  %v2040_v10 = vld [vmem:[#allocation10 + $0x8] sm:$0xff] }
  0x82   :  { %926 = vmatpush.bf16.msra.mxu2 %v1669_v25 }
  0x83   :  { %940 = vmatpush.bf16.msra.mxu3 %v1733_v26 }
  0x84   :  { %899 = vmatpush.bf16.msra.mxu0 %v1533_v19  ;;  %v2048_v19 = vld [vmem:[#allocation10 + $0x48] sm:$0xff] }
  0x85   :  { %913 = vmatpush.bf16.msra.mxu1 %v1597_v20  ;;  %v512_v20 = vperm.slane %v510_v17, 0 }
  0x86   :  { %927 = vmatpush.bf16.msra.mxu2 %v1661_v34 }
  0x87   :  { %941 = vmatpush.bf16.msra.mxu3 %v1725_v37 }
  0xc4   :  { %v387_v28 = vpop.f32.mrf.mxu0 }
  0xc5   :  { %v401_v33 = vpop.f32.mrf.mxu1  ;;  %v388_v38 = vadd.f32 %v387_v28, %v204_v32 }
  0xc6   :  { %v402_v39 = vadd.f32 %v401_v33, %v205_v36 }
  0xc7   :  { %v434_v43 = vmax.f32 %v388_v38, 0.0 }
  0xc8   :  { %v435_v46 = vmax.f32 %v402_v39, 0.0 }
  0xcc   :  { %v415_v40 = vpop.f32.mrf.mxu2  ;;  %v389_v42 = vpop.f32.mrf.mxu0 }
  0xcd   :  { %v429_v41 = vpop.f32.mrf.mxu3  ;;  %v390_v44 = vadd.f32 %v389_v42, %v204_v32  ;;  %v403_v45 = vpop.f32.mrf.mxu1  ;;  %v416_v54 = vadd.f32 %v415_v40, %v206_v47 }
  0xce   :  { %v404_v48 = vadd.f32 %v403_v45, %v205_v36  ;;  %v430_v56 = vadd.f32 %v429_v41, %v207_v49  ;;  %v513_v36 = vperm.slane %v510_v17, 1 }
  0xcf   :  { %v438_v50 = vmax.f32 %v390_v44, 0.0  ;;  %v436_v61 = vmax.f32 %v416_v54, 0.0 }
  0xd0   :  { %v439_v51 = vmax.f32 %v404_v48, 0.0  ;;  %v437_v63 = vmax.f32 %v430_v56, 0.0 }
  0xd1   :  { %v442_v53 = vpack.c.bf16 %v438_v50, %v434_v43 }
  0xd2   :  { %v443_v55 = vpack.c.bf16 %v439_v51, %v435_v46 }
  0xd3   :  { %844 = vmatmul.bf16.vlgmr.msrb.gmra.mxu0 %v442_v53 }
  0xd4   :  { %v417_v57 = vpop.f32.mrf.mxu2  ;;  %858 = vmatmul.bf16.vlgmr.msrb.gmra.mxu1 %v443_v55  ;;  %1086 = vmatpush.bf16.msrb.mxu0 %v2046_v52 }
  0xd5   :  { %v418_v58 = vadd.f32 %v417_v57, %v206_v47  ;;  %v431_v59 = vpop.f32.mrf.mxu3  ;;  %1100 = vmatpush.bf16.msrb.mxu1 %v2054_v7 }
  0xd6   :  { %v432_v60 = vadd.f32 %v431_v59, %v207_v49  ;;  %v2062_v59 = vld [vmem:[#allocation11 + $0x38] sm:$0xff] }
  0xd7   :  { %v440_v62 = vmax.f32 %v418_v58, 0.0 }
  0xd8   :  { %v441_v0 = vmax.f32 %v432_v60, 0.0  ;;  %1087 = vmatpush.bf16.msrb.mxu0 %v2045_v3  ;;  %v2061_v60 = vld [vmem:[#allocation11 + $0x30] sm:$0xff]  ;;  %v2070_v3 = vld [vmem:[#allocation13 + $0x38] sm:$0xff] }
  0xd9   :  { %v444_v1 = vpack.c.bf16 %v440_v62, %v436_v61  ;;  %1101 = vmatpush.bf16.msrb.mxu1 %v2053_v9  ;;  %v2060_v61 = vld [vmem:[#allocation11 + $0x28] sm:$0xff]  ;;  %v2059_v62 = vld [vmem:[#allocation11 + $0x20] sm:$0xff]  ;;  %v2094_v9 = vld [vmem:[%s2480_s6] ss:$0 sm:$0xff] }
  0xda   :  { %v445_v2 = vpack.c.bf16 %v441_v0, %v437_v63  ;;  %v2058_v63 = vld [vmem:[#allocation11 + $0x18] sm:$0xff]  ;;  %v2057_v0 = vld [vmem:[#allocation11 + $0x10] sm:$0xff] }
  0xdb   :  { %872 = vmatmul.bf16.vlgmr.msrb.gmra.mxu2 %v444_v1 }
  0xdc   :  { %886 = vmatmul.bf16.vlgmr.msrb.gmra.mxu3 %v445_v2  ;;  %1088 = vmatpush.bf16.msrb.mxu0 %v2044_v4  ;;  %v2069_v4 = vld [vmem:[#allocation13 + $0x30] sm:$0xff] }
  0xdd   :  { %1102 = vmatpush.bf16.msrb.mxu1 %v2052_v11  ;;  %1185 = vmatpush.bf16.msrb.mxu2 %v2062_v59 }
  0xde   :  { %1270 = vmatpush.bf16.msrb.mxu3 %v2070_v3 }
  0xe0   :  { %1089 = vmatpush.bf16.msrb.mxu0 %v2043_v5  ;;  %v2068_v5 = vld [vmem:[#allocation13 + $0x28] sm:$0xff] }
  0xe1   :  { %1103 = vmatpush.bf16.msrb.mxu1 %v2051_v13  ;;  %1186 = vmatpush.bf16.msrb.mxu2 %v2061_v60 }
  0xe2   :  { %1271 = vmatpush.bf16.msrb.mxu3 %v2069_v4 }
  0xe3   :  { %900 = vmatmul.bf16.vlgmr.msra.gmra.mxu0 %v442_v53 }
  0xe4   :  { %914 = vmatmul.bf16.vlgmr.msra.gmra.mxu1 %v443_v55  ;;  %1090 = vmatpush.bf16.msrb.mxu0 %v2042_v6  ;;  %v2067_v6 = vld [vmem:[#allocation13 + $0x20] sm:$0xff] }
  0xe5   :  { %1104 = vmatpush.bf16.msrb.mxu1 %v2050_v14  ;;  %1187 = vmatpush.bf16.msrb.mxu2 %v2060_v61 }
  0xe6   :  { %1272 = vmatpush.bf16.msrb.mxu3 %v2068_v5 }
  0xe8   :  { %1091 = vmatpush.bf16.msrb.mxu0 %v2041_v8 }
  0xe9   :  { %1105 = vmatpush.bf16.msrb.mxu1 %v2049_v16  ;;  %1188 = vmatpush.bf16.msrb.mxu2 %v2059_v62 }
  0xea   :  { %1273 = vmatpush.bf16.msrb.mxu3 %v2067_v6 }
  0xeb   :  { %928 = vmatmul.bf16.vlgmr.msra.gmra.mxu2 %v444_v1  ;;  %v2056_v1 = vld [vmem:[#allocation11 + $0x8] sm:$0xff] }
  0xec   :  { %942 = vmatmul.bf16.vlgmr.msra.gmra.mxu3 %v445_v2  ;;  %1092 = vmatpush.bf16.msrb.mxu0 %v2040_v10  ;;  %v2055_v2 = vld [vmem:[#allocation11] sm:$0xff] }
  0xed   :  { %1106 = vmatpush.bf16.msrb.mxu1 %v2048_v19  ;;  %1189 = vmatpush.bf16.msrb.mxu2 %v2058_v63  ;;  %v2066_v19 = vld [vmem:[#allocation13 + $0x18] sm:$0xff] }
  0xee   :  { %1274 = vmatpush.bf16.msrb.mxu3 %v2066_v19 }
  0xf0   :  { %1093 = vmatpush.bf16.msrb.mxu0 %v2039_v12 }
  0xf1   :  { %1107 = vmatpush.bf16.msrb.mxu1 %v2047_v22  ;;  %1190 = vmatpush.bf16.msrb.mxu2 %v2057_v0  ;;  %v2063_v22 = vld [vmem:[#allocation13] sm:$0xff] }
  0xf5   :  { %1191 = vmatpush.bf16.msrb.mxu2 %v2056_v1 }
  0xf9   :  { %1192 = vmatpush.bf16.msrb.mxu2 %v2055_v2 }
 0x150   :  { %v845_v15 = vpop.f32.mrf.mxu0 }
 0x151   :  { %v859_v18 = vpop.f32.mrf.mxu1  ;;  %v846_v23 = vadd.f32 %v845_v15, %v512_v20 }
 0x153   :  { %v860_v27 = vadd.f32 %v859_v18, %v846_v23  ;;  %v2078_v23 = vld [vmem:[#allocation14 + $0x38] sm:$0xff] }
 0x154   :  { %1355 = vmatpush.bf16.msra.mxu0 %v2078_v23 }
 0x158   :  { %v847_v21 = vpop.f32.mrf.mxu0 }
 0x159   :  { %v861_v26 = vpop.f32.mrf.mxu1  ;;  %v848_v28 = vadd.f32 %v847_v21, %v512_v20  ;;  %v2065_v20 = vld [vmem:[#allocation13 + $0x10] sm:$0xff]  ;;  %v2064_v21 = vld [vmem:[#allocation13 + $0x8] sm:$0xff] }
 0x15a   :  { %1275 = vmatpush.bf16.msrb.mxu3 %v2065_v20 }
 0x15b   :  { %v862_v31 = vadd.f32 %v861_v26, %v848_v28  ;;  %v2075_v26 = vld [vmem:[#allocation14 + $0x20] sm:$0xff]  ;;  %v2095_v28 = vld [vmem:[%s2482_s8] ss:$0 sm:$0xff] }
 0x15e   :  { %v873_v24 = vpop.f32.mrf.mxu2  ;;  %1276 = vmatpush.bf16.msrb.mxu3 %v2064_v21 }
 0x15f   :  { %v887_v25 = vpop.f32.mrf.mxu3  ;;  %v874_v29 = vadd.f32 %v873_v24, %v860_v27  ;;  %v2077_v24 = vld [vmem:[#allocation14 + $0x30] sm:$0xff] }
 0x160   :  { %v901_v30 = vpop.f32.mrf.mxu0  ;;  %1356 = vmatpush.bf16.msra.mxu0 %v2077_v24 }
 0x161   :  { %v888_v33 = vadd.f32 %v887_v25, %v874_v29  ;;  %v915_v38 = vpop.f32.mrf.mxu1  ;;  %v902_v41 = vadd.f32 %v901_v30, %v513_v36  ;;  %v2076_v25 = vld [vmem:[#allocation14 + $0x28] sm:$0xff] }
 0x162   :  { %1277 = vmatpush.bf16.msrb.mxu3 %v2063_v22 }
 0x163   :  { %v948_v39 = vmax.f32 %v888_v33, 0.0  ;;  %v916_v46 = vadd.f32 %v915_v38, %v902_v41  ;;  %v2071_v38 = vld [vmem:[#allocation14] sm:$0xff] }
 0x164   :  { %1357 = vmatpush.bf16.msra.mxu0 %v2076_v25 }
 0x166   :  { %v875_v32 = vpop.f32.mrf.mxu2 }
 0x167   :  { %v876_v34 = vadd.f32 %v875_v32, %v862_v31  ;;  %v889_v35 = vpop.f32.mrf.mxu3 }
 0x168   :  { %v903_v43 = vpop.f32.mrf.mxu0  ;;  %1358 = vmatpush.bf16.msra.mxu0 %v2075_v26 }
 0x169   :  { %v890_v37 = vadd.f32 %v889_v35, %v876_v34  ;;  %v904_v47 = vadd.f32 %v903_v43, %v513_v36  ;;  %v917_v49 = vpop.f32.mrf.mxu1  ;;  %v2074_v35 = vld [vmem:[#allocation14 + $0x18] sm:$0xff]  ;;  %v2073_v36 = vld [vmem:[#allocation14 + $0x10] sm:$0xff] }
 0x16b   :  { %v950_v40 = vmax.f32 %v890_v37, 0.0  ;;  %v918_v50 = vadd.f32 %v917_v49, %v904_v47  ;;  %v2072_v37 = vld [vmem:[#allocation14 + $0x8] sm:$0xff]  ;;  %v2097_v47 = vld [vmem:[%s2486_s12] ss:$0 sm:$0xff] }
 0x16c   :  { %1359 = vmatpush.bf16.msra.mxu0 %v2074_v35 }
 0x16d   :  { %v952_v42 = vpack.c.bf16 %v950_v40, %v948_v39  ;;  %v2096_v40 = vld [vmem:[%s2484_s10] ss:$0 sm:$0xff]  ;;  %s1377_s10 = sshll.u32 %s2487_s13, 4  ;;  %s1378_s10 = int_to_ptr.hbm [resolvable:$true] %s1377_s10 }
 0x16e   :  { %v929_v44 = vpop.f32.mrf.mxu2 }
 0x16f   :  { %v943_v45 = vpop.f32.mrf.mxu3  ;;  %1094 = vmatmul.bf16.vlgmr.msrb.gmra.mxu0 %v952_v42  ;;  %v930_v48 = vadd.f32 %v929_v44, %v916_v46 }
 0x170   :  { %1360 = vmatpush.bf16.msra.mxu0 %v2073_v36 }
 0x171   :  { %v944_v52 = vadd.f32 %v943_v45, %v930_v48 }
 0x173   :  { %v949_v56 = vmax.f32 %v944_v52, 0.0 }
 0x174   :  { %1361 = vmatpush.bf16.msra.mxu0 %v2072_v37 }
 0x176   :  { %v931_v51 = vpop.f32.mrf.mxu2 }
 0x177   :  { %v932_v53 = vadd.f32 %v931_v51, %v918_v50  ;;  %v945_v54 = vpop.f32.mrf.mxu3 }
 0x178   :  { %1362 = vmatpush.bf16.msra.mxu0 %v2071_v38 }
 0x179   :  { %v946_v55 = vadd.f32 %v945_v54, %v932_v53 }
 0x17b   :  { %v951_v57 = vmax.f32 %v946_v55, 0.0 }
 0x17d   :  { %v953_v58 = vpack.c.bf16 %v951_v57, %v949_v56 }
 0x17f   :  { %1108 = vmatmul.bf16.vlgmr.msrb.gmra.mxu1 %v953_v58 }
 0x1ec   :  { %v1095_v7 = vpop.f32.mrf.mxu0 }
 0x1ed   :  { %v1096_v11 = vadd.f32 %v2094_v9, %v1095_v7 }
 0x1f4   :  { %v1097_v10 = vpop.f32.mrf.mxu0 }
 0x1f5   :  { %v1098_v12 = vadd.f32 %v2094_v9, %v1097_v10 }
 0x1fc   :  { %v1109_v8 = vpop.f32.mrf.mxu1 }
 0x1fd   :  { %v1110_v13 = vadd.f32 %v1109_v8, %v1096_v11 }
 0x1ff   :  { %v1114_v16 = vmax.f32 %v1110_v13, 0.0 }
 0x204   :  { %v1111_v14 = vpop.f32.mrf.mxu1 }
 0x205   :  { %v1112_v15 = vadd.f32 %v1111_v14, %v1098_v12 }
 0x207   :  { %v1115_v17 = vmax.f32 %v1112_v15, 0.0 }
 0x209   :  { %v1116_v18 = vpack.c.bf16 %v1115_v17, %v1114_v16 }
 0x20b   :  { %1193 = vmatmul.bf16.vlgmr.msrb.gmra.mxu2 %v1116_v18 }
 0x28e   :  { %v1194_v27 = vpop.f32.mrf.mxu2 }
 0x28f   :  { %v1195_v29 = vadd.f32 %v2095_v28, %v1194_v27 }
 0x291   :  { %v1199_v32 = vmax.f32 %v1195_v29, 0.0 }
 0x296   :  { %v1196_v30 = vpop.f32.mrf.mxu2 }
 0x297   :  { %v1197_v31 = vadd.f32 %v2095_v28, %v1196_v30 }
 0x299   :  { %v1200_v33 = vmax.f32 %v1197_v31, 0.0 }
 0x29b   :  { %v1201_v34 = vpack.c.bf16 %v1200_v33, %v1199_v32 }
 0x29d   :  { %1278 = vmatmul.bf16.vlgmr.msrb.gmra.mxu3 %v1201_v34 }
 0x320   :  { %v1279_v39 = vpop.f32.mrf.mxu3 }
 0x321   :  { %v1280_v41 = vadd.f32 %v2096_v40, %v1279_v39 }
 0x323   :  { %v1284_v44 = vmax.f32 %v1280_v41, 0.0 }
 0x328   :  { %v1281_v42 = vpop.f32.mrf.mxu3 }
 0x329   :  { %v1282_v43 = vadd.f32 %v2096_v40, %v1281_v42 }
 0x32b   :  { %v1285_v45 = vmax.f32 %v1282_v43, 0.0 }
 0x32d   :  { %v1286_v46 = vpack.c.bf16 %v1285_v45, %v1284_v44 }
 0x32f   :  { %1363 = vmatmul.bf16.vlgmr.msra.gmra.mxu0 %v1286_v46 }
 0x3ac   :  { %v1364_v48 = vpop.f32.mrf.mxu0 }
 0x3ad   :  { %v1365_v49 = vadd.f32 %v2097_v47, %v1364_v48 }
 0x3af   :  { %1369 = vst [vmem:[#allocation16] sm:$0xff] %v1365_v49 }
 0x3b4   :  { %v1366_v50 = vpop.f32.mrf.mxu0 }
 0x3b5   :  { %v1367_v51 = vadd.f32 %v2097_v47, %v1366_v50 }
 0x3b7   :  { %1370 = vst [vmem:[#allocation16 + $0x8] sm:$0xff] %v1367_v51 }
 0x3b8   :  { %1383 = dma.vmem_to_hbm [thread:$0]  %s1376_s18, 256, %s1378_s10, [#allocation4], %s2330_s20, %s2330_s20, %s2331_s21  }
 0x3b9   :  { %2324 = dma.done.wait [#allocation4], 256  }
 0x3ba   :  { %2325 = vsyncadd [#allocation4], 4294967040 }
 0x3bb   :  { %1388 = vsyncpa [#allocation3], 1 }
 0x3bc   :  { %1389 = vsyncpa [#allocation6], 1 }
 0x3bd   :  { %1390 = vsyncpa [#allocation9], 1 }
 0x3be   :  { %1391 = vsyncpa [#allocation12], 1 }
 0x3bf   :  { %1392 = vsyncpa [#allocation15], 1 }
 0x3c0   :  { %1393 = vsyncpa [#allocation4], 1 }

</bundles_post_ra>
